<compile_context>
chip_gen: v7x
topology: tpu7x:2x2x1
jax: 0.10.0
libtpu: 0.0.40
codegen_flags: <defaults>
</compile_context>

<pallas_src>
import jax
import jax.numpy as jnp
from jax.experimental import pallas as pl
from jax.experimental.pallas import tpu as pltpu

HIDDEN = 256


# --------------------------------- kernel -----------------------------------

def _critic_kernel(state_ref, action_ref, w14_ref, w25_ref, misc_ref, q12_ref):
    """Fused twin-Q forward.

    Operands (all full blocks, VMEM resident):
      state_ref : f32  [B, state_dim]
      action_ref: f32  [B, action_dim]
      w14_ref   : bf16 [state_dim+action_dim, 512]   (cols 0:256=W1, 256:512=W4)
      w25_ref   : bf16 [2, 256, 256]                 (W2, W5)
      misc_ref  : f32  [4, 512]
                  row0 = b1||b4, row1 = b2||b5, row2 = w3_row||w6_row,
                  row3 = [b3, b6, 0...]
      q12_ref   : f32  [B, 2]   (col0 = q1, col1 = q2)
    """
    H = HIDDEN
    sd = state_ref.shape[1]                      # static

    misc = misc_ref[...]                         # f32 [4, 512]
    s = state_ref[...].astype(jnp.bfloat16)      # [B, sd]   tiny cast
    a = action_ref[...].astype(jnp.bfloat16)     # [B, ad]   tiny cast

    # ---- layer 1: both branches at once, split-K over state/action rows ----
    hg = (jnp.dot(s, w14_ref[0:sd, :], preferred_element_type=jnp.float32)
          + jnp.dot(a, w14_ref[sd:, :], preferred_element_type=jnp.float32)
          + misc[0:1, :])
    # Single bf16 pack of one [B,512] tile: feeds the bf16 layer-2 MXU weights.
    hg = jnp.maximum(hg, 0.0).astype(jnp.bfloat16)

    h = hg[:, :H]        # Q1 branch hidden  (lane slice @256: free)
    g = hg[:, H:]        # Q2 branch hidden

    # ---- layer 2: two independent 256x256 MXU matmuls, f32 accumulation ----
    h2 = jnp.maximum(
        jnp.dot(h, w25_ref[0], preferred_element_type=jnp.float32)
        + misc[1:2, :H], 0.0)                    # f32, no recast
    g2 = jnp.maximum(
        jnp.dot(g, w25_ref[1], preferred_element_type=jnp.float32)
        + misc[1:2, H:], 0.0)                    # f32, no recast

    # ---- heads on VPU/XLU (mul + lane reduce): no MXU round trip for 4 scalars
    q1 = jnp.sum(h2 * misc[2:3, :H], axis=-1, keepdims=True) + misc[3:4, 0:1]
    q2 = jnp.sum(g2 * misc[2:3, H:], axis=-1, keepdims=True) + misc[3:4, 1:2]

    q12_ref[:, 0:1] = q1.astype(q12_ref.dtype)
    q12_ref[:, 1:2] = q2.astype(q12_ref.dtype)


def critic_forward(state, action, packed_params):
    """Returns (q2, q1) — same order as the PyTorch module's `return (q2, q1)`."""
    w14, w25, misc = packed_params
    batch = state.shape[0]
    in_dim = w14.shape[0]

    vmem = pl.BlockSpec(memory_space=pltpu.MemorySpace.VMEM)
    bytes_accessed = (state.size * 4 + action.size * 4 + w14.size * 2
                      + w25.size * 2 + misc.size * 4 + batch * 2 * 4)
    flops = (2 * batch * (in_dim * 2 * HIDDEN + 2 * HIDDEN * HIDDEN)
             + 4 * batch * HIDDEN)

    q12 = pl.pallas_call(
        _critic_kernel,
        out_shape=jax.ShapeDtypeStruct((batch, 2), jnp.float32),
        in_specs=[vmem] * 5,
        out_specs=vmem,
        cost_estimate=pl.CostEstimate(
            flops=flops, transcendentals=0, bytes_accessed=bytes_accessed),
    )(state, action, w14, w25, misc)

    q1 = q12[:, 0:1]
    q2 = q12[:, 1:2]
    return q2, q1


# ---------------------------- parameter handling ----------------------------

def init_linear(key, in_dim, out_dim):
    """PyTorch nn.Linear default init: U(-1/sqrt(in), 1/sqrt(in)) for W and b."""
    kw, kb = jax.random.split(key)
    bound = 1.0 / jnp.sqrt(jnp.float32(in_dim))
    w = jax.random.uniform(kw, (in_dim, out_dim), jnp.float32, -bound, bound)
    b = jax.random.uniform(kb, (1, out_dim), jnp.float32, -bound, bound)
    return w, b


def init_critic_params(key, state_dim, action_dim):
    in_dim = state_dim + action_dim
    keys = jax.random.split(key, 6)
    w1, b1 = init_linear(keys[0], in_dim, HIDDEN)
    w2, b2 = init_linear(keys[1], HIDDEN, HIDDEN)
    w3, b3 = init_linear(keys[2], HIDDEN, 1)
    w4, b4 = init_linear(keys[3], in_dim, HIDDEN)
    w5, b5 = init_linear(keys[4], HIDDEN, HIDDEN)
    w6, b6 = init_linear(keys[5], HIDDEN, 1)
    return (w1, b1, w2, b2, w3, b3, w4, b4, w5, b5, w6, b6)


def pack_params(params):
    """Pack/fuse the 12 f32 Linear params into 5 kernel operands."""
    (w1, b1, w2, b2, w3, b3, w4, b4, w5, b5, w6, b6) = params
    w14 = jnp.concatenate([w1, w4], axis=1).astype(jnp.bfloat16)   # [in, 512]
    w25 = jnp.stack([w2, w5], axis=0).astype(jnp.bfloat16)         # [2, 256, 256]
    row0 = jnp.concatenate([b1, b4], axis=1)                       # biases layer 1
    row1 = jnp.concatenate([b2, b5], axis=1)                       # biases layer 2
    row2 = jnp.concatenate([w3.T, w6.T], axis=1)                   # head weight rows
    row3 = jnp.concatenate(
        [b3, b6, jnp.zeros((1, 2 * HIDDEN - 2), jnp.float32)], axis=1)  # head biases
    misc = jnp.concatenate([row0, row1, row2, row3], axis=0).astype(jnp.float32)
    return (w14, w25, misc)


# ------------------------------- references ---------------------------------

def critic_forward_ref(state, action, params):
    """Pure-JAX f32 reference on the original unpacked params."""
    sa = jnp.concatenate([state, action], axis=1)
    (w1, b1, w2, b2, w3, b3, w4, b4, w5, b5, w6, b6) = params
    h = jnp.maximum(sa @ w1 + b1, 0.0)
    h = jnp.maximum(h @ w2 + b2, 0.0)
    q1 = h @ w3 + b3
    g = jnp.maximum(sa @ w4 + b4, 0.0)
    g = jnp.maximum(g @ w5 + b5, 0.0)
    q2 = g @ w6 + b6
    return q2, q1


def critic_forward_bf16_ref(state, action, packed_params):
    """Pure-JAX mirror of the kernel's exact bf16-weight / f32-accumulate math
    (including the split-K layer-1 reassociation and the VPU-style heads)."""
    w14, w25, misc = packed_params
    H = HIDDEN
    sd = state.shape[1]
    s = state.astype(jnp.bfloat16)
    a = action.astype(jnp.bfloat16)
    hg = (jnp.dot(s, w14[:sd], preferred_element_type=jnp.float32)
          + jnp.dot(a, w14[sd:], preferred_element_type=jnp.float32)
          + misc[0:1, :])
    hg = jnp.maximum(hg, 0.0).astype(jnp.bfloat16)
    h, g = hg[:, :H], hg[:, H:]
    h2 = jnp.maximum(
        jnp.dot(h, w25[0], preferred_element_type=jnp.float32) + misc[1:2, :H], 0.0)
    g2 = jnp.maximum(
        jnp.dot(g, w25[1], preferred_element_type=jnp.float32) + misc[1:2, H:], 0.0)
    q1 = jnp.sum(h2 * misc[2:3, :H], axis=-1, keepdims=True) + misc[3:4, 0:1]
    q2 = jnp.sum(g2 * misc[2:3, H:], axis=-1, keepdims=True) + misc[3:4, 1:2]
    return q2, q1


# --------------------------------- main --------------------------------------

if __name__ == "__main__":
    # Hopper-v5: observation dim = 11, action dim = 3.
    state_dim, action_dim, batch = 11, 3, 2

    key = jax.random.PRNGKey(0)
    k_params, k_state, k_action = jax.random.split(key, 3)

    params = init_critic_params(k_params, state_dim, action_dim)
    packed = pack_params(params)
    state = jax.random.normal(k_state, (batch, state_dim), jnp.float32)
    action = jax.random.normal(k_action, (batch, action_dim), jnp.float32)

    q2, q1 = critic_forward(state, action, packed)
    q2 = jax.block_until_ready(q2)
    q1 = jax.block_until_ready(q1)
    assert q2.shape == (batch, 1) and q1.shape == (batch, 1)

    # Tight check: Pallas kernel vs identical bf16/f32-acc math in plain JAX.
    q2_b, q1_b = critic_forward_bf16_ref(state, action, packed)
    assert jnp.allclose(q2, q2_b, atol=1e-3, rtol=1e-3)
    assert jnp.allclose(q1, q1_b, atol=1e-3, rtol=1e-3)

    # Loose check: bf16-weight kernel vs full-f32 reference (quantization only).
    q2_f, q1_f = critic_forward_ref(state, action, params)
    assert jnp.allclose(q2, q2_f, atol=5e-2, rtol=5e-2)
    assert jnp.allclose(q1, q1_f, atol=5e-2, rtol=5e-2)

    print("KERNEL_OK")
</pallas_src>

<mosaic_0001>
module attributes {stable_mosaic.version = 11 : i64} {
  func.func @_critic_kernel(%arg0: memref<2x11xf32, #tpu.memory_space<vmem>>, %arg1: memref<2x3xf32, #tpu.memory_space<vmem>>, %arg2: memref<14x512xbf16, #tpu.memory_space<vmem>>, %arg3: memref<2x256x256xbf16, #tpu.memory_space<vmem>>, %arg4: memref<4x512xf32, #tpu.memory_space<vmem>>, %arg5: memref<2x2xf32, #tpu.memory_space<vmem>>) attributes {dimension_semantics = [], scalar_prefetch = 0 : i64, scratch_operands = 0 : i64, tpu.core_type = #tpu.core_type<tc>} {
    %c0 = arith.constant 0 : index
    %c0_0 = arith.constant 0 : index
    %0 = vector.load %arg4[%c0, %c0_0] : memref<4x512xf32, #tpu.memory_space<vmem>>, vector<4x512xf32>
    %c0_1 = arith.constant 0 : index
    %c0_2 = arith.constant 0 : index
    %1 = vector.load %arg0[%c0_1, %c0_2] : memref<2x11xf32, #tpu.memory_space<vmem>>, vector<2x11xf32>
    %2 = arith.truncf %1 : vector<2x11xf32> to vector<2x11xbf16>
    %c0_3 = arith.constant 0 : index
    %c0_4 = arith.constant 0 : index
    %3 = vector.load %arg1[%c0_3, %c0_4] : memref<2x3xf32, #tpu.memory_space<vmem>>, vector<2x3xf32>
    %4 = arith.truncf %3 : vector<2x3xf32> to vector<2x3xbf16>
    %c0_5 = arith.constant 0 : index
    %c0_6 = arith.constant 0 : index
    %5 = vector.load %arg2[%c0_5, %c0_6] : memref<14x512xbf16, #tpu.memory_space<vmem>>, vector<11x512xbf16>
    %cst = arith.constant dense<0.000000e+00> : vector<2x512xf32>
    %6 = tpu.matmul %2, %5, %cst {dimension_numbers = #tpu.dot_dimension_numbers<[1], [0], [0], [1], [0, 0, 1, 1], [], []>} : vector<2x11xbf16>, vector<11x512xbf16>, vector<2x512xf32> -> vector<2x512xf32>
    %c11 = arith.constant 11 : index
    %c0_7 = arith.constant 0 : index
    %7 = vector.load %arg2[%c11, %c0_7] : memref<14x512xbf16, #tpu.memory_space<vmem>>, vector<3x512xbf16>
    %cst_8 = arith.constant dense<0.000000e+00> : vector<2x512xf32>
    %8 = tpu.matmul %4, %7, %cst_8 {dimension_numbers = #tpu.dot_dimension_numbers<[1], [0], [0], [1], [0, 0, 1, 1], [], []>} : vector<2x3xbf16>, vector<3x512xbf16>, vector<2x512xf32> -> vector<2x512xf32>
    %9 = arith.addf %6, %8 : vector<2x512xf32>
    %10 = vector.extract_strided_slice %0 {offsets = [0, 0], sizes = [1, 512], strides = [1, 1]} : vector<4x512xf32> to vector<1x512xf32>
    %11 = vector.broadcast %10 : vector<1x512xf32> to vector<2x512xf32>
    %12 = arith.addf %9, %11 : vector<2x512xf32>
    %cst_9 = arith.constant 0.000000e+00 : f32
    %13 = vector.broadcast %cst_9 : f32 to vector<2x512xf32>
    %14 = arith.maximumf %12, %13 : vector<2x512xf32>
    %15 = arith.truncf %14 : vector<2x512xf32> to vector<2x512xbf16>
    %16 = vector.extract_strided_slice %15 {offsets = [0, 0], sizes = [2, 256], strides = [1, 1]} : vector<2x512xbf16> to vector<2x256xbf16>
    %17 = vector.extract_strided_slice %15 {offsets = [0, 256], sizes = [2, 256], strides = [1, 1]} : vector<2x512xbf16> to vector<2x256xbf16>
    %c0_10 = arith.constant 0 : index
    %c0_11 = arith.constant 0 : index
    %c0_12 = arith.constant 0 : index
    %18 = vector.load %arg3[%c0_10, %c0_11, %c0_12] : memref<2x256x256xbf16, #tpu.memory_space<vmem>>, vector<1x256x256xbf16>
    %19 = vector.shape_cast %18 : vector<1x256x256xbf16> to vector<256x256xbf16>
    %cst_13 = arith.constant dense<0.000000e+00> : vector<2x256xf32>
    %20 = tpu.matmul %16, %19, %cst_13 {dimension_numbers = #tpu.dot_dimension_numbers<[1], [0], [0], [1], [0, 0, 1, 1], [], []>} : vector<2x256xbf16>, vector<256x256xbf16>, vector<2x256xf32> -> vector<2x256xf32>
    %21 = vector.extract_strided_slice %0 {offsets = [1, 0], sizes = [1, 256], strides = [1, 1]} : vector<4x512xf32> to vector<1x256xf32>
    %22 = vector.broadcast %21 : vector<1x256xf32> to vector<2x256xf32>
    %23 = arith.addf %20, %22 : vector<2x256xf32>
    %cst_14 = arith.constant 0.000000e+00 : f32
    %24 = vector.broadcast %cst_14 : f32 to vector<2x256xf32>
    %25 = arith.maximumf %23, %24 : vector<2x256xf32>
    %c1 = arith.constant 1 : index
    %c0_15 = arith.constant 0 : index
    %c0_16 = arith.constant 0 : index
    %26 = vector.load %arg3[%c1, %c0_15, %c0_16] : memref<2x256x256xbf16, #tpu.memory_space<vmem>>, vector<1x256x256xbf16>
    %27 = vector.shape_cast %26 : vector<1x256x256xbf16> to vector<256x256xbf16>
    %cst_17 = arith.constant dense<0.000000e+00> : vector<2x256xf32>
    %28 = tpu.matmul %17, %27, %cst_17 {dimension_numbers = #tpu.dot_dimension_numbers<[1], [0], [0], [1], [0, 0, 1, 1], [], []>} : vector<2x256xbf16>, vector<256x256xbf16>, vector<2x256xf32> -> vector<2x256xf32>
    %29 = vector.extract_strided_slice %0 {offsets = [1, 256], sizes = [1, 256], strides = [1, 1]} : vector<4x512xf32> to vector<1x256xf32>
    %30 = vector.broadcast %29 : vector<1x256xf32> to vector<2x256xf32>
    %31 = arith.addf %28, %30 : vector<2x256xf32>
    %cst_18 = arith.constant 0.000000e+00 : f32
    %32 = vector.broadcast %cst_18 : f32 to vector<2x256xf32>
    %33 = arith.maximumf %31, %32 : vector<2x256xf32>
    %34 = vector.extract_strided_slice %0 {offsets = [2, 0], sizes = [1, 256], strides = [1, 1]} : vector<4x512xf32> to vector<1x256xf32>
    %35 = vector.broadcast %34 : vector<1x256xf32> to vector<2x256xf32>
    %36 = arith.mulf %25, %35 : vector<2x256xf32>
    %cst_19 = arith.constant dense<0.000000e+00> : vector<2xf32>
    %37 = vector.multi_reduction <add>, %36, %cst_19 [1] : vector<2x256xf32> to vector<2xf32>
    %38 = vector.shape_cast %37 : vector<2xf32> to vector<2x1xf32>
    %39 = vector.extract_strided_slice %0 {offsets = [3, 0], sizes = [1, 1], strides = [1, 1]} : vector<4x512xf32> to vector<1x1xf32>
    %40 = vector.broadcast %39 : vector<1x1xf32> to vector<2x1xf32>
    %41 = arith.addf %38, %40 : vector<2x1xf32>
    %42 = vector.extract_strided_slice %0 {offsets = [2, 256], sizes = [1, 256], strides = [1, 1]} : vector<4x512xf32> to vector<1x256xf32>
    %43 = vector.broadcast %42 : vector<1x256xf32> to vector<2x256xf32>
    %44 = arith.mulf %33, %43 : vector<2x256xf32>
    %cst_20 = arith.constant dense<0.000000e+00> : vector<2xf32>
    %45 = vector.multi_reduction <add>, %44, %cst_20 [1] : vector<2x256xf32> to vector<2xf32>
    %46 = vector.shape_cast %45 : vector<2xf32> to vector<2x1xf32>
    %47 = vector.extract_strided_slice %0 {offsets = [3, 1], sizes = [1, 1], strides = [1, 1]} : vector<4x512xf32> to vector<1x1xf32>
    %48 = vector.broadcast %47 : vector<1x1xf32> to vector<2x1xf32>
    %49 = arith.addf %46, %48 : vector<2x1xf32>
    %c0_21 = arith.constant 0 : index
    %c0_22 = arith.constant 0 : index
    %50 = vector.load %arg5[%c0_21, %c0_22] : memref<2x2xf32, #tpu.memory_space<vmem>>, vector<2x1xf32>
    tpu.vector_store %arg5[%c0_21, %c0_22], %41 {strides = array<i32>} : memref<2x2xf32, #tpu.memory_space<vmem>>, vector<2x1xf32>,
    %c0_23 = arith.constant 0 : index
    %c1_24 = arith.constant 1 : index
    %51 = vector.load %arg5[%c0_23, %c1_24] : memref<2x2xf32, #tpu.memory_space<vmem>>, vector<2x1xf32>
    tpu.vector_store %arg5[%c0_23, %c1_24], %49 {strides = array<i32>} : memref<2x2xf32, #tpu.memory_space<vmem>>, vector<2x1xf32>,
    return
  }
}

</mosaic_0001>

<bundles_post_ra>
// kernel: tpu_custom_call.1
= control target key start
LH: loop header
LB: loop body
LE: loop exit
PB: predicated region body
PF: predicated region fallthrough
CT: control target
= control target key end

     0   :  { %10 = vsyncpa [#allocation3], 0  ;;  %s1431_s0 = inlined_call_operand.hbm [shape: f32[2,11], index: 0, kind: input, shape index: {}]   ;;  %s1432_s1 = inlined_call_operand.vmem [shape: f32[2,3], index: 1, kind: input, shape index: {}]   ;;  %s1433_s2 = inlined_call_operand.hbm [shape: bf16[14,512], index: 2, kind: input, shape index: {}]   ;;  %s1434_s3 = inlined_call_operand.hbm [shape: bf16[2,256,256], index: 3, kind: input, shape index: {}]   ;;  %s1435_s4 = inlined_call_operand.hbm [shape: f32[4,512], index: 4, kind: input, shape index: {}]   ;;  %s1436_s5 = inlined_call_operand.hbm [shape: f32[2,2], index: 5, kind: output, shape index: {}]  }
   0x1   :  { %11 = vsyncpa [#allocation6], 0 }
   0x2   :  { %12 = vsyncpa [#allocation9], 0 }
   0x3   :  { %13 = vsyncpa [#allocation4], 0  ;;  %s1292_s18 = smov [#allocation5]   ;;  %s1174_s22 = scalar_lea.hbm %s1433_s2, 512 }
   0x4   :  { %s31_s19 = sshll.u32 %s1292_s18, 4  ;;  %p1175_p0 = scmp.ne.s32.totalorder %s1433_s2, %s1174_s22  ;;  %s32_s19 = int_to_ptr.vmem [resolvable:$true] %s31_s19 }
   0x5   :  { %p1178_p1 = scmp.lt.u32.totalorder %s1174_s22, %s1433_s2 }
   0x7   :  { %p1180_p2 = pnand %p1178_p1, %p1175_p0 }
   0x9   :  { %1183 = shalt.err (!%p1180_p2)
}
   0xa   :  { %s1184_s27 = scalar_lea.vmem %s32_s19, 512  ;;  %p1189_p4 = scmp.lt.s32.totalorder %s32_s19, %s32_s19 }
   0xb   :  { %p1185_p3 = scmp.ne.s32.totalorder %s32_s19, %s1184_s27  ;;  %p1190_p5 = scmp.lt.s32.totalorder %s1184_s27, %s1184_s27 }
   0xd   :  { %p1191_p6 = por %p1190_p5, %p1189_p4 }
   0xf   :  { %p1192_p7 = pnand %p1191_p6, %p1185_p3 }
  0x11   :  { %1195 = shalt.err (!%p1192_p7)
}
  0x12   :  { %s1293_s28 = smov 256   ;;  %s1294_s29 = smov 16  }
  0x13   :  { %37 = dma.hbm_to_vmem [thread:$0]  %s1433_s2, 512, %s32_s19, [#allocation6], %s1293_s28, %s1293_s28, %s1294_s29  }
  0x14   :  { %s1295_s7 = smov [#allocation2]   ;;  %s1296_s9 = smov [#allocation7]  }
  0x15   :  { %s20_s8 = sshll.u32 %s1295_s7, 4  ;;  %s43_s10 = sshll.u32 %s1296_s9, 4  ;;  %s21_s8 = int_to_ptr.vmem [resolvable:$true] %s20_s8  ;;  %s44_s10 = int_to_ptr.vmem [resolvable:$true] %s43_s10 }
  0x16   :  { %s1196_s13 = scalar_lea.hbm %s1431_s0, 32 }
  0x17   :  { %p1197_p8 = scmp.ne.s32.totalorder %s1431_s0, %s1196_s13  ;;  %p1200_p9 = scmp.lt.u32.totalorder %s1196_s13, %s1431_s0 }
  0x19   :  { %p1202_p10 = pnand %p1200_p9, %p1197_p8 }
  0x1b   :  { %1205 = shalt.err (!%p1202_p10)
}
  0x1c   :  { %s1206_s2 = scalar_lea.vmem %s21_s8, 32  ;;  %p1211_p12 = scmp.lt.s32.totalorder %s21_s8, %s21_s8 }
  0x1d   :  { %p1207_p11 = scmp.ne.s32.totalorder %s21_s8, %s1206_s2  ;;  %p1212_p13 = scmp.lt.s32.totalorder %s1206_s2, %s1206_s2 }
  0x1f   :  { %p1213_p0 = por %p1212_p13, %p1211_p12 }
  0x21   :  { %p1214_p1 = pnand %p1213_p0, %p1207_p11 }
  0x23   :  { %1217 = shalt.err (!%p1214_p1)
}
  0x24   :  { %23 = dma.hbm_to_vmem [thread:$0]  %s1431_s0, 32, %s21_s8, [#allocation3]  }
  0x25   :  { %s1218_s22 = scalar_lea.hbm %s1434_s3, 8192 }
  0x26   :  { %p1219_p2 = scmp.ne.s32.totalorder %s1434_s3, %s1218_s22  ;;  %p1222_p3 = scmp.lt.u32.totalorder %s1218_s22, %s1434_s3 }
  0x28   :  { %p1224_p4 = pnand %p1222_p3, %p1219_p2 }
  0x2a   :  { %1227 = shalt.err (!%p1224_p4)
}
  0x2b   :  { %s1228_s27 = scalar_lea.vmem %s44_s10, 8192  ;;  %p1233_p6 = scmp.lt.s32.totalorder %s44_s10, %s44_s10 }
  0x2c   :  { %p1229_p5 = scmp.ne.s32.totalorder %s44_s10, %s1228_s27  ;;  %p1234_p7 = scmp.lt.s32.totalorder %s1228_s27, %s1228_s27 }
  0x2e   :  { %p1235_p8 = por %p1234_p7, %p1233_p6 }
  0x30   :  { %p1236_p9 = pnand %p1235_p8, %p1229_p5 }
  0x32   :  { %1239 = shalt.err (!%p1236_p9)
}
  0x33   :  { %s1297_s0 = smov 128   ;;  %s1298_s28 = smov 8  }
  0x34   :  { %49 = dma.hbm_to_vmem [thread:$0]  %s1434_s3, 8192, %s44_s10, [#allocation6], %s1297_s0, %s1297_s0, %s1298_s28  }
  0x35   :  { %s1299_s6 = smov [#allocation8]   ;;  %s1240_s11 = scalar_lea.hbm %s1435_s4, 256 }
  0x36   :  { %s56_s7 = sshll.u32 %s1299_s6, 4  ;;  %p1241_p10 = scmp.ne.s32.totalorder %s1435_s4, %s1240_s11  ;;  %s57_s7 = int_to_ptr.vmem [resolvable:$true] %s56_s7 }
  0x37   :  { %p1244_p11 = scmp.lt.u32.totalorder %s1240_s11, %s1435_s4 }
  0x39   :  { %p1246_p12 = pnand %p1244_p11, %p1241_p10 }
  0x3b   :  { %1249 = shalt.err (!%p1246_p12)
}
  0x3c   :  { %s1250_s16 = scalar_lea.vmem %s57_s7, 256  ;;  %p1255_p0 = scmp.lt.s32.totalorder %s57_s7, %s57_s7 }
  0x3d   :  { %p1251_p13 = scmp.ne.s32.totalorder %s57_s7, %s1250_s16  ;;  %p1256_p1 = scmp.lt.s32.totalorder %s1250_s16, %s1250_s16 }
  0x3f   :  { %p1257_p2 = por %p1256_p1, %p1255_p0 }
  0x41   :  { %p1258_p3 = pnand %p1257_p2, %p1251_p13 }
  0x43   :  { %1261 = shalt.err (!%p1258_p3)
}
  0x44   :  { %59 = dma.hbm_to_vmem [thread:$0]  %s1435_s4, 256, %s57_s7, [#allocation9]  }
  0x45   :  { %1284 = dma.done.wait [#allocation3], 32  }
  0x46   :  { %1285 = vsyncadd [#allocation3], 4294967264 }
  0x47   :  { %1286 = dma.done.wait [#allocation6], 8704  }
  0x48   :  { %1287 = vsyncadd [#allocation6], 4294958592 }
  0x49   :  { %1288 = dma.done.wait [#allocation9], 256  }
  0x4a   :  { %1289 = vsyncadd [#allocation9], 4294967040  ;;  %v1300_v0 = vmov 0   ;;  %vm131_vm0 = vcmask 1040384   ;;  %vm249_vm1 = vcmask 1044480   ;;  %vm132_vm2 = vcmask 1041408  }
  0x4b   :  { %179 = vmatprep.mubr.bf16.mxu0 %v1300_v0  ;;  %220 = vmatprep.mubr.bf16.mxu1 %v1300_v0  ;;  %v1301_v1 = vmov 65535   ;;  %vm250_vm3 = vcmask 1045504   ;;  %v83_v4 = vld [vmem:[#allocation5 + $0x10] sm:$0x66]  ;;  %v84_v5 = vld [vmem:[#allocation5 + $0x18] sm:$0x66] }
  0x4c   :  { %v133_v2 = vsel %vm131_vm0, 4294967295, %v1301_v1  ;;  %v251_v3 = vsel %vm249_vm1, 4294967295, %v1301_v1  ;;  %v982_v6 = vcombine.high %v83_v4, %v83_v4  ;;  %v984_v7 = vcombine.high %v84_v5, %v84_v5  ;;  %v1074_v16 = vld [vmem:[#allocation5 + $0x4] ss:$16 sps:$4 sm:$0x3f]  }
  0x4d   :  { %v981_v8 = vcombine.low %v83_v4, %v83_v4  ;;  %v983_v9 = vcombine.low %v84_v5, %v84_v5  ;;  %v134_v10 = vsel %vm132_vm2, %v133_v2, 0  ;;  %v252_v11 = vsel %vm250_vm3, %v251_v3, 0  ;;  %v77_v29 = vld [vmem:[%s1432_s1] sm:$0x3]  ;;  %v1080_v46 = vld [vmem:[#allocation7 + $0x4] ss:$8 sps:$4 sm:$0xff]  }
  0x4e   :  { %v104_v12 = vshrl.u32 %v982_v6, 16  ;;  %v107_v13 = vshll.u32 %v982_v6, 16  ;;  %v120_v14 = vshrl.u32 %v984_v7, 16  ;;  %v123_v15 = vshll.u32 %v984_v7, 16  ;;  %v1083_v47 = vld [vmem:[#allocation7 + $0x104] ss:$8 sps:$4 sm:$0xff]  }
  0x4f   :  { %v96_v17 = vshrl.u32 %v981_v8, 16  ;;  %v99_v18 = vshll.u32 %v981_v8, 16  ;;  %v112_v19 = vshrl.u32 %v983_v9, 16  ;;  %v115_v20 = vshll.u32 %v983_v9, 16  ;;  %v75_v48 = vld [vmem:[#allocation2] sm:$0x3] }
  0x50   :  { %v106_v21 = vrot.slane %v104_v12, 1  ;;  %v109_v22 = vrot.slane %v107_v13, 2  ;;  %v122_v23 = vrot.slane %v120_v14, 1  ;;  %v125_v24 = vrot.slane %v123_v15, 2  ;;  %v1078_v50 = vld [vmem:[#allocation7] ss:$8 sps:$4 sm:$0xff]  }
  0x51   :  { %v98_v25 = vrot.slane %v96_v17, 1  ;;  %v101_v26 = vrot.slane %v99_v18, 2  ;;  %v114_v27 = vrot.slane %v112_v19, 1  ;;  %v117_v28 = vrot.slane %v115_v20, 2  ;;  %v1081_v51 = vld [vmem:[#allocation7 + $0x100] ss:$8 sps:$4 sm:$0xff]  }
  0x52   :  { %v110_v30 = vor.u32 %v109_v22, %v106_v21  ;;  %v126_v31 = vor.u32 %v125_v24, %v122_v23  ;;  %v1072_v32 = vld [vmem:[#allocation5] ss:$16 sps:$4 sm:$0x3f]   ;;  %v1077_v33 = vld [vmem:[#allocation5 + $0xc] ss:$16 sps:$4 sm:$0x3f]   ;;  %v257_v39 = vand.u32 %v1074_v16, %v252_v11  ;;  %v78_v43 = vpack.c.bf16 %v77_v29, %v77_v29 }
  0x53   :  { %v102_v34 = vor.u32 %v101_v26, %v98_v25  ;;  %v118_v35 = vor.u32 %v117_v28, %v114_v27  ;;  %v1075_v36 = vld [vmem:[#allocation5 + $0x8] ss:$16 sps:$4 sm:$0x3f]   ;;  %v263_v40 = vand.u32 %v1077_v33, %v252_v11  ;;  %vm127_vm4 = vcmask 23552   ;;  %v1086_v52 = vld [vmem:[#allocation7 + $0x14] ss:$8 sps:$4 sm:$0xff]  }
  0x54   :  { %v139_v37 = vand.u32 %v134_v10, %v110_v30  ;;  %v145_v38 = vand.u32 %v134_v10, %v126_v31  ;;  %v254_v44 = vand.u32 %v1072_v32, %v252_v11  ;;  %v260_v45 = vand.u32 %v1075_v36, %v252_v11  ;;  %v1089_v53 = vld [vmem:[#allocation7 + $0x114] ss:$8 sps:$4 sm:$0xff]   ;;  %v1084_v54 = vld [vmem:[#allocation7 + $0x10] ss:$8 sps:$4 sm:$0xff]   ;;  %v1092_v56 = vld [vmem:[#allocation7 + $0x24] ss:$8 sps:$4 sm:$0xff]  }
  0x55   :  { %v136_v41 = vand.u32 %v134_v10, %v102_v34  ;;  %v142_v42 = vand.u32 %v134_v10, %v118_v35  ;;  %v76_v49 = vpack.c.bf16 %v75_v48, %v75_v48  ;;  %vm245_vm5 = vcmask 89088   ;;  %v1087_v55 = vld [vmem:[#allocation7 + $0x110] ss:$8 sps:$4 sm:$0xff]   ;;  %v1095_v57 = vld [vmem:[#allocation7 + $0x124] ss:$8 sps:$4 sm:$0xff]   ;;  %s1302_s1 = smov [#allocation10]  }
  0x56   :  { %147 = vmatprep.subr.bf16.mxu0 %v139_v37  ;;  %188 = vmatprep.subr.bf16.mxu1 %v145_v38  ;;  %v1090_v58 = vld [vmem:[#allocation7 + $0x20] ss:$8 sps:$4 sm:$0xff]   ;;  %v1098_v60 = vld [vmem:[#allocation7 + $0x34] ss:$8 sps:$4 sm:$0xff]   ;;  %v1096_v62 = vld [vmem:[#allocation7 + $0x30] ss:$8 sps:$4 sm:$0xff]   ;;  %v349_v48 = vlaneseq }
  0x57   :  { %148 = vmatpush1.bf16.msra.mxu0 %v136_v41  ;;  %189 = vmatpush1.bf16.msra.mxu1 %v142_v42  ;;  %v1093_v59 = vld [vmem:[#allocation7 + $0x120] ss:$8 sps:$4 sm:$0xff]   ;;  %v1101_v61 = vld [vmem:[#allocation7 + $0x134] ss:$8 sps:$4 sm:$0xff]   ;;  %v1099_v63 = vld [vmem:[#allocation7 + $0x130] ss:$8 sps:$4 sm:$0xff]  }
  0x58   :  { %265 = vmatprep.subr.bf16.mxu0 %v257_v39  ;;  %306 = vmatprep.subr.bf16.mxu1 %v263_v40  ;;  %v1107_v1 = vld [vmem:[#allocation7 + $0x144] ss:$8 sps:$4 sm:$0xff]   ;;  %v1102_v2 = vld [vmem:[#allocation7 + $0x40] ss:$8 sps:$4 sm:$0xff]   ;;  %v1110_v4 = vld [vmem:[#allocation7 + $0x54] ss:$8 sps:$4 sm:$0xff]  }
  0x59   :  { %v1105_v3 = vld [vmem:[#allocation7 + $0x140] ss:$8 sps:$4 sm:$0xff]   ;;  %v1113_v5 = vld [vmem:[#allocation7 + $0x154] ss:$8 sps:$4 sm:$0xff]   ;;  %v1108_v6 = vld [vmem:[#allocation7 + $0x50] ss:$8 sps:$4 sm:$0xff]  }
  0x5a   :  { %985 = vmatmul.mubr.msk.bf16.vlgmr.msra.gmra.mrb[0].mxu0 %vm127_vm4, %v78_v43  ;;  %986 = vmatmul.mubr.msk.bf16.vlgmr.msra.gmra.mrb[0].mxu1 %vm127_vm4, %v78_v43  ;;  %v1111_v7 = vld [vmem:[#allocation7 + $0x150] ss:$8 sps:$4 sm:$0xff]   ;;  %v1116_v8 = vld [vmem:[#allocation7 + $0x64] ss:$8 sps:$4 sm:$0xff]   ;;  %v1114_v10 = vld [vmem:[#allocation7 + $0x60] ss:$8 sps:$4 sm:$0xff]  }
  0x5b   :  { %266 = vmatpush1.bf16.msra.mxu0 %v254_v44  ;;  %307 = vmatpush1.bf16.msra.mxu1 %v260_v45  ;;  %v1119_v9 = vld [vmem:[#allocation7 + $0x164] ss:$8 sps:$4 sm:$0xff]   ;;  %v1117_v11 = vld [vmem:[#allocation7 + $0x160] ss:$8 sps:$4 sm:$0xff]   ;;  %v1122_v12 = vld [vmem:[#allocation7 + $0x74] ss:$8 sps:$4 sm:$0xff]  }
  0x5c   :  { %297 = vmatprep.mubr.bf16.mxu0 %v1300_v0  ;;  %338 = vmatprep.mubr.bf16.mxu1 %v1300_v0  ;;  %v1104_v0 = vld [vmem:[#allocation7 + $0x44] ss:$8 sps:$4 sm:$0xff]   ;;  %v1125_v13 = vld [vmem:[#allocation7 + $0x174] ss:$8 sps:$4 sm:$0xff]   ;;  %v1120_v14 = vld [vmem:[#allocation7 + $0x70] ss:$8 sps:$4 sm:$0xff]  }
  0x5d   :  { %607 = vmatprep.subr.bf16.mxu0 %v1080_v46  ;;  %861 = vmatprep.subr.bf16.mxu1 %v1083_v47  ;;  %v1123_v15 = vld [vmem:[#allocation7 + $0x170] ss:$8 sps:$4 sm:$0xff]   ;;  %v1128_v16 = vld [vmem:[#allocation7 + $0x84] ss:$8 sps:$4 sm:$0xff]   ;;  %v1126_v18 = vld [vmem:[#allocation7 + $0x80] ss:$8 sps:$4 sm:$0xff]  }
  0x5e   :  { %v1131_v17 = vld [vmem:[#allocation7 + $0x184] ss:$8 sps:$4 sm:$0xff]   ;;  %v1129_v19 = vld [vmem:[#allocation7 + $0x180] ss:$8 sps:$4 sm:$0xff]   ;;  %v1134_v20 = vld [vmem:[#allocation7 + $0x94] ss:$8 sps:$4 sm:$0xff]  }
  0x5f   :  { %v1137_v21 = vld [vmem:[#allocation7 + $0x194] ss:$8 sps:$4 sm:$0xff]   ;;  %v1132_v22 = vld [vmem:[#allocation7 + $0x90] ss:$8 sps:$4 sm:$0xff]   ;;  %v1140_v24 = vld [vmem:[#allocation7 + $0xa4] ss:$8 sps:$4 sm:$0xff]  }
  0x60   :  { %v1135_v23 = vld [vmem:[#allocation7 + $0x190] ss:$8 sps:$4 sm:$0xff]   ;;  %v1143_v25 = vld [vmem:[#allocation7 + $0x1a4] ss:$8 sps:$4 sm:$0xff]   ;;  %v1138_v26 = vld [vmem:[#allocation7 + $0xa0] ss:$8 sps:$4 sm:$0xff]  }
  0x61   :  { %v1141_v27 = vld [vmem:[#allocation7 + $0x1a0] ss:$8 sps:$4 sm:$0xff]   ;;  %v1146_v28 = vld [vmem:[#allocation7 + $0xb4] ss:$8 sps:$4 sm:$0xff]   ;;  %v1144_v30 = vld [vmem:[#allocation7 + $0xb0] ss:$8 sps:$4 sm:$0xff]  }
  0x62   :  { %991 = vmatmul.mubr.msk.bf16.vlgmr.msra.gmra.mrb[4].mxu0 %vm245_vm5, %v76_v49  ;;  %992 = vmatmul.mubr.msk.bf16.vlgmr.msra.gmra.mrb[4].mxu1 %vm245_vm5, %v76_v49  ;;  %v1149_v29 = vld [vmem:[#allocation7 + $0x1b4] ss:$8 sps:$4 sm:$0xff]   ;;  %v1147_v31 = vld [vmem:[#allocation7 + $0x1b0] ss:$8 sps:$4 sm:$0xff]   ;;  %v1152_v32 = vld [vmem:[#allocation7 + $0xc4] ss:$8 sps:$4 sm:$0xff]  }
  0x63   :  { %608 = vmatpush1.bf16.msra.mxu0 %v1078_v50  ;;  %862 = vmatpush1.bf16.msra.mxu1 %v1081_v51  ;;  %v1155_v33 = vld [vmem:[#allocation7 + $0x1c4] ss:$8 sps:$4 sm:$0xff]   ;;  %v1150_v34 = vld [vmem:[#allocation7 + $0xc0] ss:$8 sps:$4 sm:$0xff]   ;;  %v1158_v36 = vld [vmem:[#allocation7 + $0xd4] ss:$8 sps:$4 sm:$0xff]  }
  0x64   :  { %609 = vmatprep.subr.bf16.mxu0 %v1086_v52  ;;  %863 = vmatprep.subr.bf16.mxu1 %v1089_v53  ;;  %v1153_v35 = vld [vmem:[#allocation7 + $0x1c0] ss:$8 sps:$4 sm:$0xff]   ;;  %v1156_v37 = vld [vmem:[#allocation7 + $0xd0] ss:$8 sps:$4 sm:$0xff]   ;;  %v1161_v39 = vld [vmem:[#allocation7 + $0x1d4] ss:$8 sps:$4 sm:$0xff]  }
  0x65   :  { %v1159_v38 = vld [vmem:[#allocation7 + $0x1d0] ss:$8 sps:$4 sm:$0xff]   ;;  %v1164_v40 = vld [vmem:[#allocation7 + $0xe4] ss:$8 sps:$4 sm:$0xff]   ;;  %v1162_v42 = vld [vmem:[#allocation7 + $0xe0] ss:$8 sps:$4 sm:$0xff]  }
  0x66   :  { %v1167_v41 = vld [vmem:[#allocation7 + $0x1e4] ss:$8 sps:$4 sm:$0xff]   ;;  %v1165_v43 = vld [vmem:[#allocation7 + $0x1e0] ss:$8 sps:$4 sm:$0xff]   ;;  %v1170_v44 = vld [vmem:[#allocation7 + $0xf4] ss:$8 sps:$4 sm:$0xff]  }
  0x67   :  { %610 = vmatpush1.bf16.msra.mxu0 %v1084_v54  ;;  %864 = vmatpush1.bf16.msra.mxu1 %v1087_v55  ;;  %v1173_v45 = vld [vmem:[#allocation7 + $0x1f4] ss:$8 sps:$4 sm:$0xff]   ;;  %v1168_v46 = vld [vmem:[#allocation7 + $0xf0] ss:$8 sps:$4 sm:$0xff]   ;;  %v1389_v49 = vshrl.u32 %v349_v48, 7  ;;  %v1392_v53 = vld [vmem:[#allocation8] sm:$0xff] }
  0x68   :  { %611 = vmatprep.subr.bf16.mxu0 %v1092_v56  ;;  %865 = vmatprep.subr.bf16.mxu1 %v1095_v57  ;;  %v1171_v47 = vld [vmem:[#allocation7 + $0x1f0] ss:$8 sps:$4 sm:$0xff]   ;;  %v1394_v54 = vld [vmem:[#allocation8 + $0x8] sm:$0xff]  ;;  %vm960_vm6 = vcmask 1024   ;;  %s970_s2 = sshll.u32 %s1302_s1, 4  ;;  %vm962_vm7 = vcmask 9224   ;;  %s971_s2 = int_to_ptr.vmem [resolvable:$true] %s970_s2 }
  0x69   :  { %v351_v50 = vsub.s32 0, %v1389_v49  ;;  %v355_v55 = vsub.s32 4, %v1389_v49  ;;  %s1262_s18 = scalar_lea.vmem %s971_s2, 32  ;;  %p1267_p5 = scmp.lt.s32.totalorder %s971_s2, %s971_s2 }
  0x6a   :  { %p1263_p4 = scmp.ne.s32.totalorder %s971_s2, %s1262_s18  ;;  %p1268_p6 = scmp.lt.s32.totalorder %s1262_s18, %s1262_s18 }
  0x6b   :  { %612 = vmatpush1.bf16.msra.mxu0 %v1090_v58  ;;  %866 = vmatpush1.bf16.msra.mxu1 %v1093_v59 }
  0x6c   :  { %613 = vmatprep.subr.bf16.mxu0 %v1098_v60  ;;  %867 = vmatprep.subr.bf16.mxu1 %v1101_v61  ;;  %p1269_p7 = por %p1268_p6, %p1267_p5 }
  0x6e   :  { %p1270_p8 = pnand %p1269_p7, %p1263_p4 }
  0x6f   :  { %614 = vmatpush1.bf16.msra.mxu0 %v1096_v62  ;;  %868 = vmatpush1.bf16.msra.mxu1 %v1099_v63  ;;  %v352_v62 = vrot.slane %v1392_v53, %v351_v50  ;;  %v360_v63 = vrot.slane %v1394_v54, %v351_v50 }
  0x70   :  { %615 = vmatprep.subr.bf16.mxu0 %v1104_v0  ;;  %869 = vmatprep.subr.bf16.mxu1 %v1107_v1  ;;  %v356_v0 = vrot.slane %v1392_v53, %v355_v55  ;;  %v364_v1 = vrot.slane %v1394_v54, %v355_v55 }
  0x73   :  { %616 = vmatpush1.bf16.msra.mxu0 %v1102_v2  ;;  %870 = vmatpush1.bf16.msra.mxu1 %v1105_v3  ;;  %v372_v2 = vrot.slane %v352_v62, %v351_v50  ;;  %v380_v3 = vrot.slane %v360_v63, %v351_v50 }
  0x74   :  { %617 = vmatprep.subr.bf16.mxu0 %v1110_v4  ;;  %871 = vmatprep.subr.bf16.mxu1 %v1113_v5 }
  0x77   :  { %618 = vmatpush1.bf16.msra.mxu0 %v1108_v6  ;;  %872 = vmatpush1.bf16.msra.mxu1 %v1111_v7  ;;  %v376_v6 = vrot.slane %v356_v0, %v351_v50  ;;  %v384_v7 = vrot.slane %v364_v1, %v351_v50 }
  0x78   :  { %619 = vmatprep.subr.bf16.mxu0 %v1116_v8  ;;  %873 = vmatprep.subr.bf16.mxu1 %v1119_v9 }
  0x7b   :  { %620 = vmatpush1.bf16.msra.mxu0 %v1114_v10  ;;  %874 = vmatpush1.bf16.msra.mxu1 %v1117_v11 }
  0x7c   :  { %621 = vmatprep.subr.bf16.mxu0 %v1122_v12  ;;  %875 = vmatprep.subr.bf16.mxu1 %v1125_v13 }
  0x7f   :  { %622 = vmatpush1.bf16.msra.mxu0 %v1120_v14  ;;  %876 = vmatpush1.bf16.msra.mxu1 %v1123_v15 }
  0x80   :  { %623 = vmatprep.subr.bf16.mxu0 %v1128_v16  ;;  %877 = vmatprep.subr.bf16.mxu1 %v1131_v17 }
  0x83   :  { %624 = vmatpush1.bf16.msra.mxu0 %v1126_v18  ;;  %878 = vmatpush1.bf16.msra.mxu1 %v1129_v19 }
  0x84   :  { %625 = vmatprep.subr.bf16.mxu0 %v1134_v20  ;;  %879 = vmatprep.subr.bf16.mxu1 %v1137_v21 }
  0x87   :  { %626 = vmatpush1.bf16.msra.mxu0 %v1132_v22  ;;  %880 = vmatpush1.bf16.msra.mxu1 %v1135_v23 }
  0x88   :  { %627 = vmatprep.subr.bf16.mxu0 %v1140_v24  ;;  %881 = vmatprep.subr.bf16.mxu1 %v1143_v25 }
  0x8b   :  { %628 = vmatpush1.bf16.msra.mxu0 %v1138_v26  ;;  %882 = vmatpush1.bf16.msra.mxu1 %v1141_v27 }
  0x8c   :  { %629 = vmatprep.subr.bf16.mxu0 %v1146_v28  ;;  %883 = vmatprep.subr.bf16.mxu1 %v1149_v29 }
  0x8f   :  { %630 = vmatpush1.bf16.msra.mxu0 %v1144_v30  ;;  %884 = vmatpush1.bf16.msra.mxu1 %v1147_v31  ;;  %v431_v30 = vsub.s32 1, %v1389_v49  ;;  %v435_v31 = vsub.s32 5, %v1389_v49 }
  0x90   :  { %631 = vmatprep.subr.bf16.mxu0 %v1152_v32  ;;  %885 = vmatprep.subr.bf16.mxu1 %v1155_v33 }
  0x91   :  { %v432_v32 = vrot.slane %v1392_v53, %v431_v30  ;;  %v686_v33 = vrot.slane %v1394_v54, %v431_v30 }
  0x93   :  { %632 = vmatpush1.bf16.msra.mxu0 %v1150_v34  ;;  %886 = vmatpush1.bf16.msra.mxu1 %v1153_v35  ;;  %v906_v34 = vsub.s32 2, %v1389_v49  ;;  %v436_v35 = vrot.slane %v1392_v53, %v435_v31 }
  0x94   :  { %633 = vmatprep.subr.bf16.mxu0 %v1158_v36  ;;  %887 = vmatprep.subr.bf16.mxu1 %v1161_v39  ;;  %v690_v36 = vrot.slane %v1394_v54, %v435_v31  ;;  %v696_v39 = vrot.slane %v686_v33, %v431_v30 }
  0x97   :  { %634 = vmatpush1.bf16.msra.mxu0 %v1156_v37  ;;  %888 = vmatpush1.bf16.msra.mxu1 %v1159_v38  ;;  %v910_v37 = vsub.s32 6, %v1389_v49  ;;  %v442_v38 = vrot.slane %v432_v32, %v431_v30 }
  0x98   :  { %635 = vmatprep.subr.bf16.mxu0 %v1164_v40  ;;  %889 = vmatprep.subr.bf16.mxu1 %v1167_v41  ;;  %v937_v40 = vrot.slane %v1394_v54, %v906_v34  ;;  %v907_v41 = vrot.slane %v1392_v53, %v906_v34 }
  0x9b   :  { %636 = vmatpush1.bf16.msra.mxu0 %v1162_v42  ;;  %890 = vmatpush1.bf16.msra.mxu1 %v1165_v43  ;;  %v446_v42 = vrot.slane %v436_v35, %v431_v30  ;;  %v700_v43 = vrot.slane %v690_v36, %v431_v30 }
  0x9c   :  { %637 = vmatprep.subr.bf16.mxu0 %v1170_v44  ;;  %891 = vmatprep.subr.bf16.mxu1 %v1173_v45  ;;  %v941_v44 = vrot.slane %v1394_v54, %v910_v37  ;;  %v911_v45 = vrot.slane %v1392_v53, %v910_v37 }
  0x9e   :  { %v921_v62 = vrot.slane %v911_v45, %v906_v34 }
  0x9f   :  { %638 = vmatpush1.bf16.msra.mxu0 %v1168_v46  ;;  %892 = vmatpush1.bf16.msra.mxu1 %v1171_v47 }
 0x12d   :  { %v181_v51 = vpop.f32.mrb[0].mxu0  ;;  %v222_v52 = vpop.f32.mrb[0].mxu1 }
 0x12e   :  { %v183_v56 = vpop.f32.mrb[1].mxu0  ;;  %v224_v57 = vpop.f32.mrb[1].mxu1 }
 0x12f   :  { %v185_v58 = vpop.f32.mrb[2].mxu0  ;;  %v226_v59 = vpop.f32.mrb[2].mxu1 }
 0x130   :  { %v186_v60 = vpop.f32.mrb[3].mxu0  ;;  %v227_v61 = vpop.f32.mrb[3].mxu1  ;;  %v951_v59 = vrot.slane %v941_v44, %v906_v34 }
 0x135   :  { %v299_v4 = vpop.f32.mrb[4].mxu0  ;;  %v340_v5 = vpop.f32.mrb[4].mxu1 }
 0x136   :  { %v300_v8 = vadd.f32 %v299_v4, %v181_v51  ;;  %v341_v9 = vadd.f32 %v340_v5, %v222_v52  ;;  %v301_v10 = vpop.f32.mrb[5].mxu0  ;;  %v342_v11 = vpop.f32.mrb[5].mxu1  ;;  %v947_v51 = vrot.slane %v937_v40, %v906_v34 }
 0x137   :  { %v302_v12 = vadd.f32 %v301_v10, %v183_v56  ;;  %v343_v13 = vadd.f32 %v342_v11, %v224_v57  ;;  %v303_v14 = vpop.f32.mrb[6].mxu0  ;;  %v344_v15 = vpop.f32.mrb[6].mxu1  ;;  %v917_v56 = vrot.slane %v907_v41, %v906_v34 }
 0x138   :  { %v385_v16 = vadd.f32 %v372_v2, %v300_v8  ;;  %v387_v17 = vadd.f32 %v380_v3, %v341_v9  ;;  %v304_v18 = vpop.f32.mrb[7].mxu0  ;;  %v345_v19 = vpop.f32.mrb[7].mxu1  ;;  %v931_v14 = vsub.s32 3, %v1389_v49 }
 0x139   :  { %v386_v20 = vadd.f32 %v376_v6, %v302_v12  ;;  %v388_v21 = vadd.f32 %v384_v7, %v343_v13 }
 0x13a   :  { %v389_v22 = vmax.f32 %v385_v16, 0.0  ;;  %v391_v23 = vmax.f32 %v387_v17, 0.0  ;;  %v932_v15 = vrot.slane %v1392_v53, %v931_v14 }
 0x13b   :  { %v390_v24 = vmax.f32 %v386_v20, 0.0  ;;  %v392_v25 = vmax.f32 %v388_v21, 0.0 }
 0x13c   :  { %v393_v28 = vpack.c.bf16 %v389_v22, %v389_v22  ;;  %v395_v29 = vpack.c.bf16 %v391_v23, %v391_v23 }
 0x13d   :  { %v394_v26 = vpack.c.bf16 %v390_v24, %v390_v24  ;;  %v396_v27 = vpack.c.bf16 %v392_v25, %v392_v25 }
 0x13f   :  { %639 = vmatprep.mubr.bf16.mxu0 %v394_v26  ;;  %893 = vmatprep.mubr.bf16.mxu1 %v396_v27 }
 0x140   :  { %640 = vmatmul.mubr.bf16.vlgmr.msra.gmra.mrb[8].mxu0 %v393_v28  ;;  %894 = vmatmul.mubr.bf16.vlgmr.msra.gmra.mrb[8].mxu1 %v395_v29 }
 0x213   :  { %v641_v46 = vpop.f32.mrb[8].mxu0  ;;  %v895_v47 = vpop.f32.mrb[8].mxu1 }
 0x214   :  { %v642_v48 = vadd.f32 %v641_v46, %v442_v38  ;;  %v896_v50 = vadd.f32 %v895_v47, %v696_v39  ;;  %v643_v52 = vpop.f32.mrb[9].mxu0  ;;  %v897_v55 = vpop.f32.mrb[9].mxu1 }
 0x215   :  { %v644_v57 = vadd.f32 %v643_v52, %v446_v42  ;;  %v898_v58 = vadd.f32 %v897_v55, %v700_v43  ;;  %v645_v60 = vpop.f32.mrb[10].mxu0  ;;  %v899_v61 = vpop.f32.mrb[10].mxu1 }
 0x216   :  { %v648_v63 = vmax.f32 %v642_v48, 0.0  ;;  %v902_v0 = vmax.f32 %v896_v50, 0.0  ;;  %v646_v1 = vpop.f32.mrb[11].mxu0  ;;  %v900_v54 = vpop.f32.mrb[11].mxu1 }
 0x217   :  { %v649_v2 = vmax.f32 %v644_v57, 0.0  ;;  %v903_v3 = vmax.f32 %v898_v58, 0.0 }
 0x218   :  { %v952_v4 = vmul.f32 %v947_v51, %v902_v0  ;;  %v922_v5 = vmul.f32 %v917_v56, %v648_v63 }
 0x219   :  { %v953_v6 = vmul.f32 %v951_v59, %v903_v3  ;;  %v923_v7 = vmul.f32 %v921_v62, %v649_v2 }
 0x21a   :  { %v924_v8 = vsel %vm132_vm2, %v922_v5, 0.0  ;;  %v954_v9 = vsel %vm132_vm2, %v952_v4, 0.0 }
 0x21b   :  { %v925_v10 = vsel %vm132_vm2, %v923_v7, 0.0  ;;  %v955_v11 = vsel %vm132_vm2, %v953_v6, 0.0 }
 0x21c   :  { %v926_v12 = vadd.f32 %v925_v10, %v924_v8  ;;  %v956_v13 = vadd.f32 %v955_v11, %v954_v9 }
 0x21e   :  { %927 = vadd.xlane.f32.xlu0 %v926_v12 }
 0x222   :  { %957 = vadd.xlane.f32.xlu0 %v956_v13 }
 0x2ab   :  { %v928_v16 = vpop.xlane.xlu0 %927 }
 0x2ac   :  { %v933_v17 = vadd.f32 %v932_v15, %v928_v16 }
 0x2ae   :  { %961 = vst.msk [vmem:[#allocation10] sm:$0x3] %vm960_vm6, %v933_v17 }
 0x2af   :  { %v958_v18 = vpop.xlane.xlu0 %957 }
 0x2b0   :  { %v959_v19 = vadd.f32 %v958_v18, %v932_v15 }
 0x2b2   :  { %963 = vst.msk [vmem:[#allocation10] sm:$0x3] %vm962_vm7, %v959_v19 }
 0x2b3   :  { %1273 = shalt.err (!%p1270_p8)
}
 0x2b4   :  { %s1274_s21 = scalar_lea.hbm %s1436_s5, 32 }
 0x2b5   :  { %p1275_p9 = scmp.ne.s32.totalorder %s1436_s5, %s1274_s21  ;;  %p1278_p10 = scmp.lt.u32.totalorder %s1274_s21, %s1436_s5 }
 0x2b7   :  { %p1280_p11 = pnand %p1278_p10, %p1275_p9 }
 0x2b9   :  { %1283 = shalt.err (!%p1280_p11)
}
 0x2ba   :  { %973 = dma.vmem_to_hbm [thread:$0]  %s971_s2, 32, %s1436_s5, [#allocation4]  }
 0x2bb   :  { %1290 = dma.done.wait [#allocation4], 32  }
 0x2bc   :  { %1291 = vsyncadd [#allocation4], 4294967264 }
 0x2bd   :  { %977 = vsyncpa [#allocation3], 1 }
 0x2be   :  { %978 = vsyncpa [#allocation6], 1 }
 0x2bf   :  { %979 = vsyncpa [#allocation9], 1 }
 0x2c0   :  { %980 = vsyncpa [#allocation4], 1 }

</bundles_post_ra>
